<compile_context>
chip_gen: v7x
topology: tpu7x:2x2x1
jax: 0.10.0
libtpu: 0.0.40
codegen_flags: <defaults>
</compile_context>

<pallas_src>
import functools

import jax
import jax.numpy as jnp
from jax.experimental import pallas as pl
from jax.experimental.pallas import tpu as pltpu


def _round_up(x, m):
    return ((x + m - 1) // m) * m


def _vmem_capacity_bytes():
    cap = 64 * 1024 * 1024  # conservative default (v7x per-TC VMEM)
    try:
        info = pltpu.get_tpu_info()
        cap = int(getattr(info, "vmem_capacity_bytes", cap))
    except Exception:
        pass
    return cap


def _tile_footprint(tm, tn, tk, k_steps, itemsize):
    # Double-buffered x / W / bias / out tiles (+ f32 accumulator if multi-K).
    f = 2 * (tm * tk + tn * tk + tn + tm * tn) * itemsize
    if k_steps > 1:
        f += tm * tn * 4
    return f


def _auto_tiles(N, M, K, itemsize):
    sub = max(8, 32 // itemsize)  # sublane multiple: 8 f32, 16 bf16, 32 int8

    # Lane-dim tiles must be a multiple of 128 or equal to the full dim.
    tn = 512 if (M % 128 == 0 and M > 512) else M
    if K % 128 == 0 and K > 1024:
        # Multi-step contraction: tk must divide K exactly (no K boundary tile).
        tk = next(c for c in (1024, 512, 256, 128) if K % c == 0)
    else:
        tk = K  # single K step, no contraction padding needed
    k_steps = pl.cdiv(K, tk)

    budget = min(_vmem_capacity_bytes() // 2, 40 * 1024 * 1024)
    tm = min(2048, _round_up(N, sub))
    while tm > sub and _tile_footprint(tm, tn, tk, k_steps, itemsize) > budget:
        tm = max(sub, _round_up(tm // 2, sub))

    # v7x has 2 TensorCores: ensure >= 2 tiles on the parallel axes when possible.
    if pl.cdiv(N, tm) * pl.cdiv(M, tn) < 2 and N >= 2 * sub:
        tm = _round_up(pl.cdiv(N, 2), sub)

    return tm, tn, tk


def _wire_kernel_single_k(x_ref, w_ref, b_ref, o_ref, *, omega_0, neg_s0_sq):
    # x_ref: (tm, K)  w_ref: (tn, K)  b_ref: (1, tn)  o_ref: (tm, tn)
    y = jax.lax.dot_general(
        x_ref[...], w_ref[...],
        dimension_numbers=(((1,), (1,)), ((), ())),
        preferred_element_type=jnp.float32,
    ) + b_ref[...]
    o_ref[...] = (jnp.sin(omega_0 * y) * jnp.exp(neg_s0_sq * (y * y))).astype(o_ref.dtype)


def _wire_kernel_multi_k(x_ref, w_ref, b_ref, o_ref, acc_ref, *, omega_0, neg_s0_sq):
    # x_ref: (tm, tk)  w_ref: (tn, tk)  b_ref: (1, tn)  o_ref/acc_ref: (tm, tn)
    k = pl.program_id(2)
    contrib = jax.lax.dot_general(
        x_ref[...], w_ref[...],
        dimension_numbers=(((1,), (1,)), ((), ())),
        preferred_element_type=jnp.float32,
    )

    @pl.when(k == 0)
    def _first():          # write-on-first-step: no separate zero-init pass
        acc_ref[...] = contrib

    @pl.when(k > 0)
    def _rest():
        acc_ref[...] += contrib

    @pl.when(k == pl.num_programs(2) - 1)
    def _finalize():
        y = acc_ref[...] + b_ref[...]
        o_ref[...] = (jnp.sin(omega_0 * y) * jnp.exp(neg_s0_sq * (y * y))).astype(o_ref.dtype)


def wire_layer_noncomplex(x, weight, bias=None, *, omega_0=30.0, s_0=30.0,
                          tm=None, tn=None, tk=None):
    """x: (N, K). weight: (M, K) (PyTorch nn.Linear layout). bias: (M,) or None."""
    N, K = x.shape
    M, K2 = weight.shape
    assert K == K2
    if bias is None:
        bias = jnp.zeros((M,), x.dtype)
    assert bias.shape == (M,)

    itemsize = jnp.dtype(x.dtype).itemsize
    a_tm, a_tn, a_tk = _auto_tiles(N, M, K, itemsize)
    tm = a_tm if tm is None else tm
    tn = a_tn if tn is None else tn
    tk = a_tk if tk is None else tk
    # The contraction axis must be covered exactly (garbage there would corrupt
    # valid outputs); N / M boundary tiles are harmlessly masked by Pallas.
    assert tk == K or (K % tk == 0 and tk % 128 == 0), "tk must tile K exactly"
    k_steps = pl.cdiv(K, tk)

    b2d = bias.reshape(1, M)
    grid = (pl.cdiv(N, tm), pl.cdiv(M, tn), k_steps)

    act_kwargs = dict(omega_0=float(omega_0), neg_s0_sq=-(float(s_0) * float(s_0)))
    if k_steps == 1:
        kernel = functools.partial(_wire_kernel_single_k, **act_kwargs)
        scratch_shapes = []
    else:
        kernel = functools.partial(_wire_kernel_multi_k, **act_kwargs)
        scratch_shapes = [pltpu.VMEM((tm, tn), jnp.float32)]

    footprint = _tile_footprint(tm, tn, tk, k_steps, itemsize)
    vmem_bytes = max(int(footprint * 1.4) + (1 << 20), 4 << 20)

    n_tiles, m_tiles = grid[0], grid[1]
    cost = pl.CostEstimate(
        flops=int(2 * N * M * K),
        transcendentals=int(2 * N * M),
        bytes_accessed=int(
            (int(x.size) * m_tiles + int(weight.size) * n_tiles
             + int(b2d.size) * n_tiles + N * M) * itemsize),
    )

    return pl.pallas_call(
        kernel,
        out_shape=jax.ShapeDtypeStruct((N, M), x.dtype),
        grid_spec=pltpu.PrefetchScalarGridSpec(
            num_scalar_prefetch=0,
            grid=grid,
            in_specs=[
                pl.BlockSpec((tm, tk), lambda i, j, k: (i, k)),   # x tile
                pl.BlockSpec((tn, tk), lambda i, j, k: (j, k)),   # W tile, (M, K) layout
                pl.BlockSpec((1, tn), lambda i, j, k: (0, j)),    # bias tile
            ],
            out_specs=pl.BlockSpec((tm, tn), lambda i, j, k: (i, j)),
            scratch_shapes=scratch_shapes,
        ),
        compiler_params=pltpu.CompilerParams(
            dimension_semantics=("parallel", "parallel", "arbitrary"),
            vmem_limit_bytes=vmem_bytes,
        ),
        cost_estimate=cost,
    )(x, weight, b2d)


def init_params(key, in_features, out_features, *, is_first=False, omega_0=30.0):
    """Deterministic init matching WireLayerNonComplex.init_weights + default Linear bias."""
    kw, kb = jax.random.split(key)
    if is_first:
        bound_w = 1.0 / in_features
    else:
        bound_w = jnp.sqrt(6.0 / in_features) / omega_0
    weight = jax.random.uniform(
        kw, (out_features, in_features), jnp.float32, minval=-bound_w, maxval=bound_w
    )
    bound_b = 1.0 / jnp.sqrt(in_features)   # PyTorch nn.Linear default bias init
    bias = jax.random.uniform(
        kb, (out_features,), jnp.float32, minval=-bound_b, maxval=bound_b
    )
    return weight, bias


def _reference(x, weight, bias, omega_0, s_0):
    y = x @ weight.T + bias
    return jnp.sin(omega_0 * y) * jnp.exp(-jnp.square(s_0 * y))


if __name__ == "__main__":
    key = jax.random.PRNGKey(0)
    omega_0, s_0 = 30.0, 30.0
    k_x, k_p, k_x2, k_p2, k_x3, k_p3 = jax.random.split(key, 6)

    # Case 1: small shapes consistent with the module (batch of coords, hidden 32).
    N, in_features, out_features = 8, 32, 32
    x = jax.random.normal(k_x, (N, in_features), jnp.float32)
    weight, bias = init_params(k_p, in_features, out_features,
                               is_first=False, omega_0=omega_0)
    out = jax.block_until_ready(
        wire_layer_noncomplex(x, weight, bias, omega_0=omega_0, s_0=s_0))
    ref = _reference(x, weight, bias, omega_0, s_0)
    assert out.shape == (N, out_features)
    assert jnp.allclose(out, ref, atol=2e-5, rtol=2e-5)

    # Case 2: non-aligned shapes (exercises the boundary-masked N / full-dim M,K path).
    N2, in2, out2 = 10, 48, 96
    x2 = jax.random.normal(k_x2, (N2, in2), jnp.float32)
    weight2, bias2 = init_params(k_p2, in2, out2, is_first=True, omega_0=omega_0)
    out_b = jax.block_until_ready(
        wire_layer_noncomplex(x2, weight2, bias2, omega_0=omega_0, s_0=s_0))
    ref_b = _reference(x2, weight2, bias2, omega_0, s_0)
    assert out_b.shape == (N2, out2)
    assert jnp.allclose(out_b, ref_b, atol=2e-5, rtol=2e-5)

    # Case 3: force the multi-K (write-on-first-step accumulator) path at small scale.
    N3, in3, out3 = 16, 256, 128
    x3 = jax.random.normal(k_x3, (N3, in3), jnp.float32)
    weight3, bias3 = init_params(k_p3, in3, out3, is_first=False, omega_0=omega_0)
    out_c = jax.block_until_ready(
        wire_layer_noncomplex(x3, weight3, bias3, omega_0=omega_0, s_0=s_0, tk=128))
    ref_c = _reference(x3, weight3, bias3, omega_0, s_0)
    assert out_c.shape == (N3, out3)
    assert jnp.allclose(out_c, ref_c, atol=2e-5, rtol=2e-5)

    print("KERNEL_OK")
</pallas_src>

<mosaic_0001>
module attributes {stable_mosaic.version = 11 : i64} {
  func.func @_wire_kernel_single_k(%arg0: i32, %arg1: i32, %arg2: i32, %arg3: memref<8x32xf32, #tpu.memory_space<vmem>>, %arg4: memref<32x32xf32, #tpu.memory_space<vmem>>, %arg5: memref<1x32xf32, #tpu.memory_space<vmem>>, %arg6: memref<8x32xf32, #tpu.memory_space<vmem>>) attributes {dimension_semantics = [#tpu.dimension_semantics<parallel>, #tpu.dimension_semantics<parallel>, #tpu.dimension_semantics<arbitrary>], iteration_bounds = array<i64: 1, 1, 1>, scalar_prefetch = 0 : i64, scratch_operands = 0 : i64, tpu.core_type = #tpu.core_type<tc>, window_params = [{transform_indices = @transform_0, window_bounds = array<i64: 8, 32>}, {transform_indices = @transform_1, window_bounds = array<i64: 32, 32>}, {transform_indices = @transform_2, window_bounds = array<i64: 1, 32>}, {transform_indices = @transform_3, window_bounds = array<i64: 8, 32>}]} {
    %c0 = arith.constant 0 : index
    %c0_0 = arith.constant 0 : index
    %0 = vector.load %arg3[%c0, %c0_0] : memref<8x32xf32, #tpu.memory_space<vmem>>, vector<8x32xf32>
    %c0_1 = arith.constant 0 : index
    %c0_2 = arith.constant 0 : index
    %1 = vector.load %arg4[%c0_1, %c0_2] : memref<32x32xf32, #tpu.memory_space<vmem>>, vector<32x32xf32>
    %cst = arith.constant dense<0.000000e+00> : vector<8x32xf32>
    %2 = tpu.matmul %0, %1, %cst {dimension_numbers = #tpu.dot_dimension_numbers<[1], [1], [0], [0], [0, 0, 1, 0], [], []>} : vector<8x32xf32>, vector<32x32xf32>, vector<8x32xf32> -> vector<8x32xf32>
    %c0_3 = arith.constant 0 : index
    %c0_4 = arith.constant 0 : index
    %3 = vector.load %arg5[%c0_3, %c0_4] : memref<1x32xf32, #tpu.memory_space<vmem>>, vector<1x32xf32>
    %4 = vector.broadcast %3 : vector<1x32xf32> to vector<8x32xf32>
    %5 = arith.addf %2, %4 : vector<8x32xf32>
    %cst_5 = arith.constant 3.000000e+01 : f32
    %6 = vector.broadcast %cst_5 : f32 to vector<8x32xf32>
    %7 = arith.mulf %6, %5 : vector<8x32xf32>
    %8 = math.sin %7 : vector<8x32xf32>
    %9 = arith.mulf %5, %5 : vector<8x32xf32>
    %cst_6 = arith.constant -9.000000e+02 : f32
    %10 = vector.broadcast %cst_6 : f32 to vector<8x32xf32>
    %11 = arith.mulf %10, %9 : vector<8x32xf32>
    %12 = math.exp %11 : vector<8x32xf32>
    %13 = arith.mulf %8, %12 : vector<8x32xf32>
    %c0_7 = arith.constant 0 : index
    %c0_8 = arith.constant 0 : index
    %14 = vector.load %arg6[%c0_7, %c0_8] : memref<8x32xf32, #tpu.memory_space<vmem>>, vector<8x32xf32>
    tpu.vector_store %arg6[%c0_7, %c0_8], %13 {strides = array<i32>} : memref<8x32xf32, #tpu.memory_space<vmem>>, vector<8x32xf32>,
    return
  }
  func.func @transform_0(%arg0: i32, %arg1: i32, %arg2: i32) -> (i32, i32) {
    %c0_i32 = arith.constant 0 : i32
    return %arg0, %arg2 : i32, i32
  }
  func.func @transform_1(%arg0: i32, %arg1: i32, %arg2: i32) -> (i32, i32) {
    %c0_i32 = arith.constant 0 : i32
    return %arg1, %arg2 : i32, i32
  }
  func.func @transform_2(%arg0: i32, %arg1: i32, %arg2: i32) -> (i32, i32) {
    %c0_i32 = arith.constant 0 : i32
    %c0_i32_0 = arith.constant 0 : i32
    return %c0_i32, %arg1 : i32, i32
  }
  func.func @transform_3(%arg0: i32, %arg1: i32, %arg2: i32) -> (i32, i32) {
    %c0_i32 = arith.constant 0 : i32
    return %arg0, %arg1 : i32, i32
  }
}

</mosaic_0001>

<bundles_post_ra>
// kernel: tpu_custom_call.1
= control target key start
LH: loop header
LB: loop body
LE: loop exit
PB: predicated region body
PF: predicated region fallthrough
CT: control target
= control target key end

     0   :  { %8 = vsyncpa [#allocation3], 0  ;;  %s506_s0 = inlined_call_operand.hbm [shape: f32[8,32], index: 0, kind: input, shape index: {}]   ;;  %s507_s1 = inlined_call_operand.hbm [shape: f32[32,32], index: 1, kind: input, shape index: {}]   ;;  %s508_s2 = inlined_call_operand.vmem [shape: f32[1,32], index: 2, kind: input, shape index: {}]   ;;  %s509_s3 = inlined_call_operand.hbm [shape: f32[8,32], index: 3, kind: output, shape index: {}]  }
   0x1   :  { %9 = vsyncpa [#allocation6], 0 }
   0x2   :  { %10 = vsyncpa [#allocation4], 0  ;;  %s396_s12 = smov [#allocation2]   ;;  %s397_s14 = smov [#allocation5]  }
   0x3   :  { %s17_s13 = sshll.u32 %s396_s12, 4  ;;  %s26_s15 = sshll.u32 %s397_s14, 4  ;;  %s18_s13 = int_to_ptr.vmem [resolvable:$true] %s17_s13  ;;  %s430_s15 = int_to_ptr.vmem [resolvable:$true] %s26_s15 }
   0x4   :  { %s324_s18 = scalar_lea.hbm %s506_s0, 128 }
   0x5   :  { %p325_p0 = scmp.ne.s32.totalorder %s506_s0, %s324_s18  ;;  %p328_p1 = scmp.lt.u32.totalorder %s324_s18, %s506_s0 }
   0x7   :  { %p330_p2 = pnand %p328_p1, %p325_p0 }
   0x9   :  { %333 = shalt.err (!%p330_p2)
}
   0xa   :  { %s334_s23 = scalar_lea.vmem %s18_s13, 128  ;;  %p339_p4 = scmp.lt.s32.totalorder %s18_s13, %s18_s13 }
   0xb   :  { %p335_p3 = scmp.ne.s32.totalorder %s18_s13, %s334_s23  ;;  %p340_p5 = scmp.lt.s32.totalorder %s334_s23, %s334_s23 }
   0xd   :  { %p341_p6 = por %p340_p5, %p339_p4 }
   0xf   :  { %p342_p7 = pnand %p341_p6, %p335_p3 }
  0x11   :  { %345 = shalt.err (!%p342_p7)
}
  0x12   :  { %20 = dma.hbm_to_vmem [thread:$0]  %s506_s0, 128, %s18_s13, [#allocation3]  }
  0x13   :  { %s346_s28 = scalar_lea.hbm %s507_s1, 512 }
  0x14   :  { %p347_p8 = scmp.ne.s32.totalorder %s507_s1, %s346_s28  ;;  %p350_p9 = scmp.lt.u32.totalorder %s346_s28, %s507_s1 }
  0x16   :  { %p352_p10 = pnand %p350_p9, %p347_p8 }
  0x18   :  { %355 = shalt.err (!%p352_p10)
}
  0x19   :  { %s356_s6 = scalar_lea.vmem %s430_s15, 512  ;;  %p361_p12 = scmp.lt.s32.totalorder %s430_s15, %s430_s15 }
  0x1a   :  { %p357_p11 = scmp.ne.s32.totalorder %s430_s15, %s356_s6  ;;  %p362_p13 = scmp.lt.s32.totalorder %s356_s6, %s356_s6 }
  0x1c   :  { %p363_p0 = por %p362_p13, %p361_p12 }
  0x1e   :  { %p364_p1 = pnand %p363_p0, %p357_p11 }
  0x20   :  { %367 = shalt.err (!%p364_p1)
}
  0x21   :  { %s398_s0 = smov 128   ;;  %s399_s7 = smov 8  }
  0x22   :  { %32 = dma.hbm_to_vmem [thread:$0]  %s507_s1, 512, %s430_s15, [#allocation6], %s398_s0, %s398_s0, %s399_s7  }
  0x23   :  { %390 = dma.done.wait [#allocation3], 128  }
  0x24   :  { %391 = vsyncadd [#allocation3], 4294967168 }
  0x25   :  { %392 = dma.done.wait [#allocation6], 512  }
  0x26   :  { %393 = vsyncadd [#allocation6], 4294966784  ;;  %v400_v0 = vmov 0.0|0.0   ;;  %vm401_vm0 = vmmov 0   ;;  %v402_v1 = vmov 0.0   ;;  %vm53_vm1 = vcmask 261120  }
  0x27   :  { %292 = vmatprep.subr.bf16.mxu0 %v400_v0  ;;  %289 = vmatprep.mubr.msk.f32.mxu0 %vm401_vm0, %v402_v1  ;;  %v42_v2 = vld [vmem:[#allocation5] sm:$0xff]  ;;  %v43_v3 = vld [vmem:[#allocation5 + $0x8] sm:$0xff]  ;;  %vm294_vm2 = vmpackc.low %vm53_vm1, %vm53_vm1  ;;  %v403_v24 = vmov 683565275   ;;  %v404_v26 = vmov 2475754826  }
  0x28   :  { %v293_v4 = vpack.c.bf16 %v43_v3, %v42_v2  ;;  %v44_v5 = vld [vmem:[#allocation5 + $0x10] sm:$0xff]  ;;  %v45_v6 = vld [vmem:[#allocation5 + $0x18] sm:$0xff]  ;;  %v405_v29 = vmov 2131351028   ;;  %v406_v32 = vmov 2102212464  }
  0x29   :  { %v297_v7 = vpack.c.bf16 %v45_v6, %v44_v5  ;;  %v41_v8 = vld [vmem:[#allocation2] sm:$0xff]  ;;  %v407_v35 = vmov 920167782   ;;  %v408_v38 = vmov 1326507024  }
  0x2a   :  { %295 = vmatpush3.bf16.xpose.msk.msra.mxu0 %vm294_vm2, %v293_v4  ;;  %v266_v9 = vld [vmem:[%s508_s2] ss:$0 sm:$0xff]  ;;  %s409_s2 = smov [#allocation7]  }
  0x2b   :  { %296 = vmatprep.subr.bf16.mxu0 %v400_v0  ;;  %s256_s11 = sshll.u32 %s409_s2, 4  ;;  %s257_s11 = int_to_ptr.vmem [resolvable:$true] %s256_s11 }
  0x2c   :  { %s368_s12 = scalar_lea.vmem %s257_s11, 128  ;;  %p373_p3 = scmp.lt.s32.totalorder %s257_s11, %s257_s11 }
  0x2d   :  { %p369_p2 = scmp.ne.s32.totalorder %s257_s11, %s368_s12  ;;  %p374_p4 = scmp.lt.s32.totalorder %s368_s12, %s368_s12 }
  0x2f   :  { %p375_p5 = por %p374_p4, %p373_p3 }
  0x31   :  { %p376_p6 = pnand %p375_p5, %p369_p2 }
  0x32   :  { %299 = vmatpush3.bf16.xpose.msk.msra.mxu0 %vm294_vm2, %v297_v7 }
  0x39   :  { %290 = vmatmul.mubr.msk.f32.vlgmr.msra.gmra.mrb[0].mxu0 %vm53_vm1, %v41_v8 }
 0x10c   :  { %v135_v10 = vpop.f32.mrb[0].mxu0 }
 0x10d   :  { %v467_v11 = vadd.f32 %v266_v9, %v135_v10  ;;  %v291_v12 = vpop.f32.mrb[1].mxu0 }
 0x10f   :  { %v470_v13 = vmul.f32 30.0, %v467_v11 }
 0x111   :  { %v143_v14 = vand.u32 2139095040, %v470_v13  ;;  %v140_v18 = vand.u32 2147483647, %v470_v13  ;;  %vm142_vm10 = vcmp.lt.s32.totalorder %v470_v13, 0  ;;  %vm232_vm15 = vweird.f32 %v470_v13 }
 0x113   :  { %v144_v15 = vshrl.u32 %v143_v14, 23  ;;  %v147_v21 = vand.u32 8388607, %v140_v18  ;;  %vm141_vm11 = vcmp.le.f32.partialorder %v140_v18, 0.7853982 }
 0x115   :  { %v272_v16 = vadd.s32 4294967169, %v144_v15  ;;  %v148_v40 = vor.u32 8388608, %v147_v21 }
 0x117   :  { %v150_v17 = vadd.s32 1, %v272_v16  ;;  %v188_v54 = vshll.u32 %v148_v40, 8 }
 0x119   :  { %vm151_vm3 = vcmp.gt.s32.totalorder %v150_v17, 0 }
 0x11a   :  { %v152_v19 = vsel %vm151_vm3, %v150_v17, 0 }
 0x11b   :  { %v154_v20 = vand.u32 31, %v152_v19  ;;  %v153_v23 = vshrl.u32 %v152_v19, 5 }
 0x11d   :  { %v155_v22 = vsub.s32 32, %v154_v20  ;;  %v157_v25 = vshll.u32 %v403_v24, %v154_v20  ;;  %v160_v27 = vshll.u32 %v404_v26, %v154_v20  ;;  %v163_v31 = vshll.u32 %v405_v29, %v154_v20 }
 0x11e   :  { %v166_v34 = vshll.u32 %v406_v32, %v154_v20  ;;  %v169_v37 = vshll.u32 %v407_v35, %v154_v20  ;;  %vm172_vm4 = vcmp.lt.s32.totalorder %v153_v23, 1  ;;  %vm175_vm5 = vcmp.lt.s32.totalorder %v153_v23, 4 }
 0x11f   :  { %v158_v28 = vshrl.u32 %v404_v26, %v155_v22  ;;  %v161_v30 = vshrl.u32 %v405_v29, %v155_v22  ;;  %v164_v33 = vshrl.u32 %v406_v32, %v155_v22  ;;  %v167_v36 = vshrl.u32 %v407_v35, %v155_v22 }
 0x120   :  { %v170_v39 = vshrl.u32 %v408_v38, %v155_v22  ;;  %v156_v49 = vshrl.u32 %v403_v24, %v155_v22  ;;  %vm174_vm6 = vcmp.lt.s32.totalorder %v153_v23, 3  ;;  %vm173_vm7 = vcmp.lt.s32.totalorder %v153_v23, 2 }
 0x121   :  { %v159_v41 = vor.u32 %v158_v28, %v157_v25  ;;  %v162_v42 = vor.u32 %v161_v30, %v160_v27  ;;  %v165_v43 = vor.u32 %v164_v33, %v163_v31  ;;  %v168_v44 = vor.u32 %v167_v36, %v166_v34 }
 0x122   :  { %v171_v45 = vor.u32 %v170_v39, %v169_v37  ;;  %v244_v28 = vmul.f32 %v467_v11, %v467_v11 }
 0x123   :  { %v177_v46 = vsel %vm175_vm5, %v165_v43, 2102212464  ;;  %v180_v47 = vsel %vm172_vm4, %v159_v41, %v162_v42  ;;  %v184_v48 = vsel %vm172_vm4, %v162_v42, %v165_v43  ;;  %v181_v50 = vsel %vm175_vm5, %v168_v44, 920167782 }
 0x124   :  { %v185_v51 = vsel %vm175_vm5, %v171_v45, 1326507024  ;;  %v182_v52 = vsel %vm174_vm6, %v165_v43, %v181_v50  ;;  %v176_v55 = vsel %vm172_vm4, %v156_v49, %v159_v41  ;;  %v178_v56 = vsel %vm174_vm6, %v162_v42, %v177_v46 }
 0x125   :  { %v186_v53 = vsel %vm174_vm6, %v168_v44, %v185_v51  ;;  %v183_v57 = vsel %vm173_vm7, %v180_v47, %v182_v52  ;;  %v179_v63 = vsel %vm173_vm7, %v176_v55, %v178_v56  ;;  %v245_v32 = vmul.f32 -900.0, %v244_v28 }
 0x126   :  { %v187_v58 = vsel %vm173_vm7, %v184_v48, %v186_v53  ;;  %v479_v61 = vmul.u32.u64.low %v188_v54, %v183_v57  ;;  %v480_v62 = vmul.u32.u64.high %v188_v54, %v183_v57, %v479_v61  ;;  %v195_v1 = vmul.u32 %v188_v54, %v179_v63 }
 0x127   :  { %v476_v59 = vmul.u32.u64.low %v188_v54, %v187_v58  ;;  %v477_v60 = vmul.u32.u64.high %v188_v54, %v187_v58, %v476_v59  ;;  %v246_v36 = vmul.f32 1.442695, %v245_v32 }
 0x128   :  { %v198_v0 = vadd.s32 1, %v480_v62 }
 0x129   :  { %vm197_vm8 = vc.u32 %v477_v60, %v479_v61  ;;  %v196_v15 = vadd.s32 %v479_v61, %v477_v60 }
 0x12a   :  { %v199_v2 = vsel %vm197_vm8, %v198_v0, %v480_v62 }
 0x12b   :  { %v200_v3 = vadd.s32 %v199_v2, %v195_v1 }
 0x12d   :  { %v201_v4 = vadd.s32 536870912, %v200_v3 }
 0x12f   :  { %v202_v5 = vshrl.u32 %v201_v4, 30 }
 0x131   :  { %v203_v6 = vshll.u32 %v202_v5, 30  ;;  %v226_v29 = vsub.s32 4, %v202_v5 }
 0x133   :  { %v204_v7 = vsub.s32 %v200_v3, %v203_v6  ;;  %v227_v33 = vsel %vm142_vm10, %v226_v29, %v202_v5 }
 0x134   :  { %v229_v35 = vsel %vm141_vm11, 0, %v227_v33 }
 0x135   :  { %v206_v8 = vsub.s32 0, %v204_v7  ;;  %v233_v37 = vadd.s32 3, %v229_v35 }
 0x137   :  { %v273_v9 = vmin.u32 %v206_v8, %v204_v7  ;;  %v234_v38 = vand.u32 3, %v233_v37 }
 0x139   :  { %v208_v10 = vclz %v273_v9  ;;  %vm239_vm12 = vcmp.eq.s32.totalorder %v234_v38, 2  ;;  %vm236_vm13 = vcmp.eq.s32.totalorder %v234_v38, 0  ;;  %vm235_vm14 = vcmp.lt.s32.totalorder %v234_v38, 2 }
 0x13b   :  { %v274_v12 = vadd.s32 4294967294, %v208_v10 }
 0x13d   :  { %vm275_vm9 = vcmp.lt.s32.totalorder %v274_v12, 0 }
 0x13e   :  { %v211_v14 = vsel %vm275_vm9, 0, %v274_v12 }
 0x13f   :  { %v212_v16 = vsub.s32 32, %v211_v14  ;;  %v216_v17 = vsub.s32 4294967266, %v211_v14  ;;  %v213_v19 = vshll.u32 %v204_v7, %v211_v14 }
 0x141   :  { %v214_v20 = vshrl.u32 %v196_v15, %v212_v16  ;;  %v217_v21 = vadd.s32 127, %v216_v17 }
 0x143   :  { %v215_v22 = vor.u32 %v214_v20, %v213_v19  ;;  %v218_v23 = vshll.u32 %v217_v21, 23 }
 0x145   :  { %v219_v24 = vor.u32 4788187, %v218_v23  ;;  %v222_v26 = vcvt.s32.f32 %v215_v22 }
 0x147   :  { %v220_v25 = vand.u32 2147483647, %v219_v24 }
 0x149   :  { %v223_v27 = vmul.f32 %v222_v26, %v220_v25 }
 0x14b   :  { %v224_v30 = vxor.u32 2147483648, %v223_v27 }
 0x14d   :  { %v225_v31 = vsel %vm142_vm10, %v224_v30, %v223_v27 }
 0x14e   :  { %v228_v34 = vsel %vm141_vm11, %v470_v13, %v225_v31 }
 0x14f   :  { %318 = vcosq.f32 %v228_v34 }
 0x150   :  { %320 = vsinq.f32 %v228_v34 }
 0x151   :  { %322 = vpow2.f32 %v246_v36 }
 0x159   :  { %v319_v11 = vpop.eup %318 }
 0x15a   :  { %v321_v39 = vpop.eup %320  ;;  %v240_v40 = vxor.u32 2147483648, %v319_v11 }
 0x15b   :  { %v237_v41 = vxor.u32 2147483648, %v321_v39  ;;  %v323_v44 = vpop.eup %322 }
 0x15c   :  { %v241_v42 = vsel %vm239_vm12, %v240_v40, %v321_v39 }
 0x15d   :  { %v238_v18 = vsel %vm236_vm13, %v319_v11, %v237_v41 }
 0x15e   :  { %v242_v43 = vsel %vm235_vm14, %v238_v18, %v241_v42 }
 0x15f   :  { %v243_v45 = vsel %vm232_vm15, nan, %v242_v43 }
 0x160   :  { %v248_v46 = vmul.f32 %v323_v44, %v243_v45 }
 0x162   :  { %249 = vst.msk [vmem:[#allocation7] sm:$0xff] %vm53_vm1, %v248_v46 }
 0x163   :  { %379 = shalt.err (!%p376_p6)
}
 0x164   :  { %s380_s15 = scalar_lea.hbm %s509_s3, 128 }
 0x165   :  { %p381_p7 = scmp.ne.s32.totalorder %s509_s3, %s380_s15  ;;  %p384_p8 = scmp.lt.u32.totalorder %s380_s15, %s509_s3 }
 0x167   :  { %p386_p9 = pnand %p384_p8, %p381_p7 }
 0x169   :  { %389 = shalt.err (!%p386_p9)
}
 0x16a   :  { %259 = dma.vmem_to_hbm [thread:$0]  %s257_s11, 128, %s509_s3, [#allocation4]  }
 0x16b   :  { %394 = dma.done.wait [#allocation4], 128  }
 0x16c   :  { %395 = vsyncadd [#allocation4], 4294967168 }
 0x16d   :  { %263 = vsyncpa [#allocation3], 1 }
 0x16e   :  { %264 = vsyncpa [#allocation6], 1 }
 0x16f   :  { %265 = vsyncpa [#allocation4], 1 }

</bundles_post_ra>
